<compile_context>
chip_gen: v7x
topology: tpu7x:2x2x1
jax: 0.10.0
libtpu: 0.0.40
codegen_flags: <defaults>
</compile_context>

<pallas_src>
import functools
import math

import jax
import jax.numpy as jnp
from jax.experimental import pallas as pl
from jax.experimental.pallas import tpu as pltpu


def _ceil_div(a: int, b: int) -> int:
    return -(-a // b)


def _layernorm_kernel(x_ref, g_ref, b_ref, o_ref, *, eps: float, features: int,
                      low_prec_affine: bool):
    # x_ref: (tile_rows, features); g_ref / b_ref: (1, features)
    x = x_ref[...].astype(jnp.float32)
    inv_n = jnp.float32(1.0 / features)
    inv_nm1 = jnp.float32(1.0 / max(features - 1, 1))  # torch std() is unbiased (N-1)
    # One-pass statistics in f32: var = (sum(x^2) - N*mean^2) / (N-1).
    mean = jnp.sum(x, axis=-1, keepdims=True) * inv_n
    sumsq = jnp.sum(x * x, axis=-1, keepdims=True)
    var = (sumsq - jnp.float32(features) * mean * mean) * inv_nm1
    var = jnp.maximum(var, jnp.float32(0.0))  # guard tiny negative from cancellation
    std = jnp.sqrt(var)
    # eps is added to std (not inside the sqrt) to match the PyTorch module.
    # approx=False keeps full precision for tight allclose vs the reference.
    inv = pl.reciprocal(std + jnp.float32(eps), approx=False)

    if low_prec_affine:
        # v6e/v7x: do the full-block affine in the native 16-bit dtype
        # (halves VALU lane pressure and f32 temp bytes); stats remain f32.
        dt = o_ref.dtype
        xo = x_ref[...]
        y = (xo - mean.astype(dt)) * inv.astype(dt) * g_ref[...].astype(dt) \
            + b_ref[...].astype(dt)
        o_ref[...] = y.astype(dt)
    else:
        gamma = g_ref[...].astype(jnp.float32)
        beta = b_ref[...].astype(jnp.float32)
        y = (x - mean) * inv * gamma + beta
        o_ref[...] = y.astype(o_ref.dtype)


def _sublane_multiple(itemsize: int) -> int:
    # Sublane packing: f32 -> 8, bf16/f16 -> 16, int8/fp8 -> 32.
    return {4: 8, 2: 16, 1: 32}.get(itemsize, 8)


def _vmem_capacity_bytes() -> int:
    """Physical VMEM per core, generation-aware with conservative fallback."""
    try:
        return int(pltpu.get_tpu_info().vmem_capacity_bytes)
    except Exception:
        pass
    try:
        kind = jax.devices()[0].device_kind.lower()
        if "v7" in kind:
            return 64 << 20
        return 128 << 20
    except Exception:
        return 64 << 20  # most conservative (v7x)


def _is_v5() -> bool:
    try:
        return "v5" in jax.devices()[0].device_kind.lower()
    except Exception:
        return False


def _pick_tile_rows(rows: int, features: int, itemsize: int, budget: int) -> int:
    """Largest sublane-aligned tile whose working set fits the VMEM budget,
    clamped so the grid has >=2 steps (megacore sharding on v7x)."""
    sub = _sublane_multiple(itemsize)
    # Per-row VMEM bytes: double-buffered input + output block (native dtype)
    # plus ~12 B/elem of f32 intermediates (x upcast, y, slack for the affine).
    per_row = features * (4 * itemsize + 12)
    tile = max(sub, budget // max(per_row, 1))
    tile = min(int(tile), 8192)            # amortize per-step overhead; no 1024 cap
    tile = (tile // sub) * sub
    tile = max(tile, sub)
    rows_rounded = _ceil_div(rows, sub) * sub
    # Keep >=2 grid steps when possible so ("parallel",) can use both v7x TCs.
    if rows_rounded >= 2 * sub:
        half = _ceil_div(_ceil_div(rows, 2), sub) * sub
        tile = min(tile, half)
    return int(min(tile, rows_rounded))


def _layernorm_reference(x, gamma, beta, eps):
    features = x.shape[-1]
    mean = jnp.mean(x.astype(jnp.float32), axis=-1, keepdims=True)
    diff = x.astype(jnp.float32) - mean
    var = jnp.sum(diff * diff, axis=-1, keepdims=True) / max(features - 1, 1)
    std = jnp.sqrt(var)
    y = gamma.astype(jnp.float32) * diff / (std + eps) + beta.astype(jnp.float32)
    return y.astype(x.dtype)


def layer_normalization(x, gamma, beta, *, eps=1e-6, tile_rows=None):
    """LayerNormalization forward. Normalizes over the last axis of x."""
    features = x.shape[-1]
    assert gamma.shape == (features,) and beta.shape == (features,)

    orig_shape = x.shape
    rows = math.prod(orig_shape[:-1]) if len(orig_shape) > 1 else 1
    itemsize = jnp.dtype(x.dtype).itemsize
    sub = _sublane_multiple(itemsize)

    physical_vmem = _vmem_capacity_bytes()
    budget = (physical_vmem * 3) // 8          # ~48 MiB on v5e/v6e, ~24 MiB on v7x
    vmem_cap = (physical_vmem * 3) // 4        # never request >75% of physical

    # Guard: a single minimal (sub, features) block + f32 temps must fit.
    min_block_bytes = sub * features * (4 * itemsize + 12) + 4 * features * itemsize
    if min_block_bytes > vmem_cap:
        # TODO(synk): implement a feature-chunked two-pass reduction Pallas kernel
        # for extreme feature widths; fall back to pure JAX to stay correct.
        return _layernorm_reference(x, gamma, beta, eps)

    x2 = x.reshape(rows, features)
    g2 = gamma.reshape(1, features)
    b2 = beta.reshape(1, features)

    if tile_rows is None:
        tile_rows = _pick_tile_rows(rows, features, itemsize, budget)

    # No padding copy: the partial last block is masked by Pallas on store; rows
    # are independent, so unspecified tail rows cannot contaminate valid rows.
    grid = (pl.cdiv(rows, tile_rows),)

    # 16-bit affine path only on chips with native 16-bit VALU (v6e/v7x).
    low_prec_affine = (jnp.dtype(x.dtype) in (jnp.dtype(jnp.bfloat16),
                                              jnp.dtype(jnp.float16))
                       and not _is_v5())

    # VMEM request: double-buffered in + out blocks + f32 temps + params + headroom.
    block_bytes = tile_rows * features * itemsize
    needed = 4 * block_bytes + tile_rows * features * 12 + 4 * features * itemsize
    vmem_limit = int(min(vmem_cap, max(16 << 20, needed + (8 << 20))))

    cost = pl.CostEstimate(
        flops=8 * rows * features,
        transcendentals=2 * rows,
        bytes_accessed=2 * rows * features * itemsize + 2 * features * itemsize,
    )

    out = pl.pallas_call(
        functools.partial(
            _layernorm_kernel, eps=float(eps), features=features,
            low_prec_affine=bool(low_prec_affine),
        ),
        out_shape=jax.ShapeDtypeStruct((rows, features), x.dtype),
        grid_spec=pltpu.PrefetchScalarGridSpec(
            num_scalar_prefetch=0,
            grid=grid,
            in_specs=[
                # Default double-buffering; only add pl.Buffered(3) if a trace
                # shows exposed input DMA on v7x.
                pl.BlockSpec((tile_rows, features), lambda i: (i, 0)),
                pl.BlockSpec((1, features), lambda i: (0, 0)),
                pl.BlockSpec((1, features), lambda i: (0, 0)),
            ],
            out_specs=pl.BlockSpec((tile_rows, features), lambda i: (i, 0)),
        ),
        compiler_params=pltpu.CompilerParams(
            dimension_semantics=("parallel",),
            vmem_limit_bytes=vmem_limit,
        ),
        cost_estimate=cost,
    )(x2, g2, b2)

    return out.reshape(orig_shape)


if __name__ == "__main__":
    key = jax.random.PRNGKey(0)
    batch, seq, hidden = 2, 8, 32   # NOTE: hidden=32 is the lane-sparse worst case

    x = jax.random.normal(key, (batch, seq, hidden), dtype=jnp.float32)

    # Parameters matching nn.Parameter(torch.ones/zeros(features)).
    gamma = jnp.ones((hidden,), dtype=jnp.float32)
    beta = jnp.zeros((hidden,), dtype=jnp.float32)

    y = layer_normalization(x, gamma, beta, eps=1e-6)
    y = jax.block_until_ready(y)

    # Pure-JAX reference replicating torch semantics (unbiased std, eps on std).
    mean = jnp.mean(x, axis=-1, keepdims=True)
    std = jnp.sqrt(jnp.sum((x - mean) ** 2, axis=-1, keepdims=True) / (hidden - 1))
    ref = gamma * (x - mean) / (std + 1e-6) + beta
    assert jnp.allclose(y, ref, atol=1e-5, rtol=1e-5), "mismatch vs reference"

    print("KERNEL_OK")
</pallas_src>

<mosaic_0001>
module attributes {stable_mosaic.version = 11 : i64} {
  func.func @_layernorm_kernel(%arg0: i32, %arg1: memref<8x32xf32, #tpu.memory_space<vmem>>, %arg2: memref<1x32xf32, #tpu.memory_space<vmem>>, %arg3: memref<1x32xf32, #tpu.memory_space<vmem>>, %arg4: memref<8x32xf32, #tpu.memory_space<vmem>>) attributes {dimension_semantics = [#tpu.dimension_semantics<parallel>], iteration_bounds = array<i64: 2>, scalar_prefetch = 0 : i64, scratch_operands = 0 : i64, tpu.core_type = #tpu.core_type<tc>, window_params = [{transform_indices = @transform_0, window_bounds = array<i64: 8, 32>}, {pipeline_mode = #tpu.pipeline_mode<synchronous>, transform_indices = @transform_1, window_bounds = array<i64: 1, 32>}, {pipeline_mode = #tpu.pipeline_mode<synchronous>, transform_indices = @transform_2, window_bounds = array<i64: 1, 32>}, {transform_indices = @transform_3, window_bounds = array<i64: 8, 32>}]} {
    %c0 = arith.constant 0 : index
    %c0_0 = arith.constant 0 : index
    %0 = vector.load %arg1[%c0, %c0_0] : memref<8x32xf32, #tpu.memory_space<vmem>>, vector<8x32xf32>
    %cst = arith.constant dense<0.000000e+00> : vector<8xf32>
    %1 = vector.multi_reduction <add>, %0, %cst [1] : vector<8x32xf32> to vector<8xf32>
    %2 = vector.shape_cast %1 : vector<8xf32> to vector<8x1xf32>
    %cst_1 = arith.constant 3.125000e-02 : f32
    %3 = vector.broadcast %cst_1 : f32 to vector<8x1xf32>
    %4 = arith.mulf %2, %3 : vector<8x1xf32>
    %5 = arith.mulf %0, %0 : vector<8x32xf32>
    %cst_2 = arith.constant dense<0.000000e+00> : vector<8xf32>
    %6 = vector.multi_reduction <add>, %5, %cst_2 [1] : vector<8x32xf32> to vector<8xf32>
    %7 = vector.shape_cast %6 : vector<8xf32> to vector<8x1xf32>
    %cst_3 = arith.constant 3.200000e+01 : f32
    %8 = vector.broadcast %cst_3 : f32 to vector<8x1xf32>
    %9 = arith.mulf %8, %4 : vector<8x1xf32>
    %10 = arith.mulf %9, %4 : vector<8x1xf32>
    %11 = arith.subf %7, %10 : vector<8x1xf32>
    %cst_4 = arith.constant 0.0322580636 : f32
    %12 = vector.broadcast %cst_4 : f32 to vector<8x1xf32>
    %13 = arith.mulf %11, %12 : vector<8x1xf32>
    %cst_5 = arith.constant 0.000000e+00 : f32
    %14 = vector.broadcast %cst_5 : f32 to vector<8x1xf32>
    %15 = arith.maximumf %13, %14 : vector<8x1xf32>
    %16 = math.sqrt %15 : vector<8x1xf32>
    %cst_6 = arith.constant 9.99999997E-7 : f32
    %17 = vector.broadcast %cst_6 : f32 to vector<8x1xf32>
    %18 = arith.addf %16, %17 : vector<8x1xf32>
    %19 = tpu.reciprocal %18 : vector<8x1xf32> -> vector<8x1xf32>
    %c0_7 = arith.constant 0 : index
    %c0_8 = arith.constant 0 : index
    %20 = vector.load %arg2[%c0_7, %c0_8] : memref<1x32xf32, #tpu.memory_space<vmem>>, vector<1x32xf32>
    %c0_9 = arith.constant 0 : index
    %c0_10 = arith.constant 0 : index
    %21 = vector.load %arg3[%c0_9, %c0_10] : memref<1x32xf32, #tpu.memory_space<vmem>>, vector<1x32xf32>
    %22 = vector.broadcast %4 : vector<8x1xf32> to vector<8x32xf32>
    %23 = arith.subf %0, %22 : vector<8x32xf32>
    %24 = vector.broadcast %19 : vector<8x1xf32> to vector<8x32xf32>
    %25 = arith.mulf %23, %24 : vector<8x32xf32>
    %26 = vector.broadcast %20 : vector<1x32xf32> to vector<8x32xf32>
    %27 = arith.mulf %25, %26 : vector<8x32xf32>
    %28 = vector.broadcast %21 : vector<1x32xf32> to vector<8x32xf32>
    %29 = arith.addf %27, %28 : vector<8x32xf32>
    %c0_11 = arith.constant 0 : index
    %c0_12 = arith.constant 0 : index
    %30 = vector.load %arg4[%c0_11, %c0_12] : memref<8x32xf32, #tpu.memory_space<vmem>>, vector<8x32xf32>
    tpu.vector_store %arg4[%c0_11, %c0_12], %29 {strides = array<i32>} : memref<8x32xf32, #tpu.memory_space<vmem>>, vector<8x32xf32>,
    return
  }
  func.func @transform_0(%arg0: i32) -> (i32, i32) {
    %c0_i32 = arith.constant 0 : i32
    %c0_i32_0 = arith.constant 0 : i32
    return %arg0, %c0_i32 : i32, i32
  }
  func.func @transform_1(%arg0: i32) -> (i32, i32) {
    %c0_i32 = arith.constant 0 : i32
    %c0_i32_0 = arith.constant 0 : i32
    %c0_i32_1 = arith.constant 0 : i32
    return %c0_i32, %c0_i32_0 : i32, i32
  }
  func.func @transform_2(%arg0: i32) -> (i32, i32) {
    %c0_i32 = arith.constant 0 : i32
    %c0_i32_0 = arith.constant 0 : i32
    %c0_i32_1 = arith.constant 0 : i32
    return %c0_i32, %c0_i32_0 : i32, i32
  }
  func.func @transform_3(%arg0: i32) -> (i32, i32) {
    %c0_i32 = arith.constant 0 : i32
    %c0_i32_0 = arith.constant 0 : i32
    return %arg0, %c0_i32 : i32, i32
  }
}

</mosaic_0001>

<bundles_post_ra>
// kernel: tpu_custom_call.1
= control target key start
LH: loop header
LB: loop body
LE: loop exit
PB: predicated region body
PF: predicated region fallthrough
CT: control target
= control target key end

     0   :  { %8 = vsyncpa [#allocation3], 0  ;;  %s671_s0 = inlined_call_operand.hbm [shape: f32[16,32], index: 0, kind: input, shape index: {}]   ;;  %s672_s1 = inlined_call_operand.vmem [shape: f32[1,32], index: 1, kind: input, shape index: {}]   ;;  %s673_s2 = inlined_call_operand.vmem [shape: f32[1,32], index: 2, kind: input, shape index: {}]   ;;  %s674_s3 = inlined_call_operand.hbm [shape: f32[16,32], index: 3, kind: output, shape index: {}]  }
   0x1   :  { %10 = vsyncpa [#allocation3 + $0x1], 0 }
   0x2   :  { %11 = vsyncpa [#allocation4], 0 }
   0x3   :  { %13 = vsyncpa [#allocation4 + $0x1], 0  ;;  %s497_s12 = smov 0   ;;  %s499_s13 = smov 0  }
   0x4   :  { %s501_s14 = smov 0   ;;  %s503_s15 = smov 0  }
   0x5 LB: > { %s518_s16 = sadd.s32 4294967295, %s473_s15   ;;  %s313_s17 = sadd.s32 4294967294, %s473_s15   ;;  %s473_s15 = sphi %s503_s15, %s689_s15   ;;  %s469_s14 = sphi %s501_s14, %s688_s14   ;;  %s465_s13 = sphi %s499_s13, %s687_s13   ;;  %s461_s12 = sphi %s497_s12, %s686_s12  }
   0x6   : > { %s522_s18 = sadd.s32 1, %s473_s15   ;;  %s26_s19 = sadd.s32 1, %s469_s14 }
   0x7   : > { %s23_s20 = ssub.s32 %s473_s15, %s522_s18  ;;  %p33_p0 = scmp.ne.s32.totalorder %s469_s14, %s465_s13 }
   0x8   : > { %p24_p1 = scmp.eq.s32.totalorder %s23_s20, 0  ;;  %p34_p2 = scmp.eq.s32.totalorder %s473_s15, 0 }
   0x9   : > { %p39_p3 = scmp.ne.s32.totalorder %s465_s13, %s461_s12  ;;  %p40_p4 = scmp.eq.s32.totalorder %s518_s16, 0 }
   0xa   : > { %s534_s21 = scalar_select %p24_p1, %s469_s14, %s26_s19  }
   0xb   : > { %p536_p5 = por %p34_p2, %p33_p0  ;;  %p540_p6 = por %p40_p4, %p39_p3 }
   0xc   : > { %p105_p7 = scmp.eq.s32.totalorder %s518_s16, 1  ;;  %p111_p8 = scmp.eq.s32.totalorder %s313_s17, 1 }
   0xd   : > { %p339_p10 = scmp.lt.s32.totalorder %s473_s15, 2  ;;  %s137_s26 = sand.u32 1, %s469_s14  }
   0xe   : > { %p547_p11 = por %p105_p7, %p33_p0  ;;  %p551_p12 = por %p111_p8, %p39_p3 }
   0xf   : > { %s317_s27 = sshll.u32 %s473_s15, 7  ;;  %s316_s28 = sshll.u32 %s137_s26, 3 }
  0x10   : > { %s678_s24 = scalar_select %p547_p11, 1, 0 }
  0x11   : > { %s679_s25 = scalar_select %p551_p12, 1, 0 }
  0x12   : > { %s560_s4 = scalar_lea.hbm %s671_s0, %s317_s27  ;;  %s141_s5 = scalar_lea.vmem [#allocation2], %s316_s28 }
  0x13   : > { %s148_s6 = sshll.u32 %s141_s5, 4  ;;  %p564_p13 = pnand %p339_p10, %p536_p5  ;;  %s568_s6 = int_to_ptr.vmem [resolvable:$true] %s148_s6 }
  0x14   : > { %s138_s8 = scalar_lea.sflag [#allocation3], %s137_s26  ;;  %s377_s9 = scalar_lea.hbm %s560_s4, 128 }
  0x15   : > { %p378_p2 = scmp.ne.s32.totalorder %s560_s4, %s377_s9  ;;  %p379_p3 = pneg %p564_p13 }
  0x16   : > { %s382_s17 = scalar_lea.hbm %s671_s0, 256  ;;  %p383_p5 = scmp.lt.u32.totalorder %s560_s4, %s671_s0 }
  0x17   : > { %p380_p4 = pnand %p379_p3, %p378_p2  ;;  %p384_p8 = scmp.lt.u32.totalorder %s382_s17, %s377_s9 }
  0x18   : > { %p386_p9 = scmp.lt.u32.totalorder %s377_s9, %s560_s4 }
  0x19   : > { %p381_p7 = pneg %p380_p4  ;;  %p385_p10 = por %p384_p8, %p383_p5 }
  0x1b   : > { %p387_p0 = por %p386_p9, %p385_p10 }
  0x1d   : > { %p388_p1 = pnand %p387_p0, %p381_p7 }
  0x1f   : > { %391 = shalt.err (!%p388_p1)
}
  0x20   : > { %s392_s22 = scalar_lea.vmem %s568_s6, 128  ;;  %s475_s26 = smov [#allocation2]  }
  0x21   : > { %p393_p2 = scmp.ne.s32.totalorder %s568_s6, %s392_s22  ;;  %s397_s27 = sshll.u32 %s475_s26, 4  ;;  %s398_s27 = int_to_ptr.vmem [resolvable:$false] %s397_s27 }
  0x22   : > { %s399_s28 = scalar_lea.vmem %s398_s27, 256  ;;  %p400_p11 = scmp.lt.s32.totalorder %s568_s6, %s398_s27 }
  0x23   : > { %p395_p4 = pnand %p393_p2, %p379_p3  ;;  %p401_p5 = scmp.lt.s32.totalorder %s399_s28, %s392_s22 }
  0x25   : > { %p396_p12 = pneg %p395_p4  ;;  %p402_p8 = por %p401_p5, %p400_p11 }
  0x27   : > { %p403_p9 = pnand %p402_p8, %p396_p12 }
  0x29   : > { %406 = shalt.err (!%p403_p9)
}
  0x2a   : > { %334 = dma.hbm_to_vmem [thread:$0]  (!%p564_p13), %s560_s4, 128, %s568_s6, %s138_s8  }
  0x2b   : > { %p681_p0 = scmp.lt.s32.totalorder %s473_s15, 3  ;;  %p682_p1 = scmp.ge.s32.totalorder %s473_s15, 1 }
  0x2d   : > { %p154_p3 = pnand %p682_p1, %p681_p0 }
  0x2e   : > { %s602_s29 = sand.u32 (!%p154_p3), 1, %s465_s13  }
  0x2f   : > { %157 = sbr.rel (%p154_p3) target bundleno = 259 (0x103), region = 32  ;;  %s319_s30 = sshll.u32 (!%p154_p3), %s602_s29, 3 }
  0x30   : > { %s160_s5 = scalar_lea.sflag (!%p154_p3), [#allocation3], %s602_s29  ;;  %s163_s7 = scalar_lea.vmem (!%p154_p3), [#allocation2], %s319_s30 }
  0x36   : > { %452 = dma.done.wait (%p540_p6), %s160_s5, 128  }
  0x37   : > { %454 = vsyncadd (%p540_p6), %s160_s5, 4294967168  ;;  %vm187_vm0 = vcmask 261120   ;;  %v186_v0 = vld [vmem:[%s163_s7] sm:$0xff]  ;;  %s324_s9 = sshll.u32 %s518_s16, 7  ;;  %s185_s10 = scalar_lea.vmem [#allocation5], %s319_s30 }
  0x38   : > { %v188_v1 = vsel %vm187_vm0, %v186_v0, 0.0  ;;  %v192_v2 = vmul.f32 %v186_v0, %v186_v0  ;;  %v321_v20 = vld [vmem:[%s672_s1] ss:$0 sm:$0xff]  ;;  %s243_s11 = sshll.u32 %s185_s10, 4  ;;  %s626_s20 = scalar_lea.hbm %s674_s3, %s324_s9  ;;  %s628_s11 = int_to_ptr.vmem [resolvable:$true] %s243_s11 }
  0x39   : > { %189 = vadd.xlane.f32.xlu0 %v188_v1  ;;  %v322_v22 = vld [vmem:[%s673_s2] ss:$0 sm:$0xff]  ;;  %s230_s22 = scalar_lea.sflag [#allocation4], %s602_s29  ;;  %s407_s26 = scalar_lea.vmem %s628_s11, 128 }
  0x3a   : > { %v193_v3 = vsel %vm187_vm0, %v192_v2, 0.0  ;;  %p408_p6 = scmp.ne.s32.totalorder %s628_s11, %s407_s26  ;;  %p683_p11 = scmp.ne.s32.totalorder %s678_s24, 0 }
  0x3b   : > { %s476_s16 = smov [#allocation5]  }
  0x3c   : > { %p409_p12 = pnand %p408_p6, %p683_p11  ;;  %s411_s27 = sshll.u32 %s476_s16, 4  ;;  %s412_s27 = int_to_ptr.vmem [resolvable:$false] %s411_s27 }
  0x3d   : > { %194 = vadd.xlane.f32.xlu0 %v193_v3  ;;  %s413_s28 = scalar_lea.vmem %s412_s27, 256  ;;  %p414_p7 = scmp.lt.s32.totalorder %s628_s11, %s412_s27 }
  0x3e   : > { %p410_p13 = pneg %p409_p12  ;;  %p415_p10 = scmp.lt.s32.totalorder %s413_s28, %s407_s26 }
  0x40   : > { %p416_p2 = por %p415_p10, %p414_p7 }
  0x42   : > { %p417_p4 = pnand %p416_p2, %p410_p13 }
  0xc6   : > { %v190_v4 = vpop.xlane.xlu0 %189 }
  0xc7   : > { %v191_v5 = vmul.f32 0.03125, %v190_v4 }
  0xc9   : > { %v196_v6 = vmul.f32 32.0, %v191_v5  ;;  %v212_v18 = vsub.f32 %v186_v0, %v191_v5 }
  0xca   : > { %v195_v7 = vpop.xlane.xlu0 %194 }
  0xcb   : > { %v197_v8 = vmul.f32 %v196_v6, %v191_v5 }
  0xcd   : > { %v198_v9 = vsub.f32 %v195_v7, %v197_v8 }
  0xcf   : > { %v199_v10 = vmul.f32 0.032258064, %v198_v9 }
  0xd1   : > { %v200_v11 = vmax.f32 %v199_v10, 0.0 }
  0xd3   : > { %373 = vrsqrt.f32 %v200_v11  ;;  %vm203_vm1 = vcmp.eq.f32.partialorder %v200_v11, inf  ;;  %v206_v14 = vand.u32 2147483648, %v200_v11  ;;  %vm205_vm2 = vcmp.eq.f32.partialorder %v200_v11, 0.0 }
  0xdd   : > { %v374_v12 = vpop.eup %373 }
  0xde   : > { %v202_v13 = vmul.f32 %v374_v12, %v200_v11 }
  0xe0   : > { %v204_v15 = vsel %vm203_vm1, %v200_v11, %v202_v13 }
  0xe1   : > { %v207_v16 = vsel %vm205_vm2, %v206_v14, %v204_v15 }
  0xe2   : > { %v208_v17 = vadd.f32 1e-06, %v207_v16 }
  0xe4   : > { %375 = vrcp.f32 %v208_v17 }
  0xee   : > { %v376_v19 = vpop.eup %375 }
  0xef   : > { %v213_v21 = vmul.f32 %v376_v19, %v212_v18 }
  0xf1   : > { %v220_v23 = vmul.f32 %v321_v20, %v213_v21 }
  0xf3   : > { %v227_v24 = vadd.f32 %v322_v22, %v220_v23 }
  0xf5   : > { %228 = vst.msk [vmem:[%s185_s10] sm:$0xff] %vm187_vm0, %v227_v24 }
  0xf6   : > { %420 = shalt.err (!%p417_p4)
}
  0xf7   : > { %s421_s29 = scalar_lea.hbm %s626_s20, 128  ;;  %s425_s7 = scalar_lea.hbm %s674_s3, 256 }
  0xf8   : > { %p422_p5 = scmp.ne.s32.totalorder %s626_s20, %s421_s29  ;;  %p426_p0 = scmp.lt.u32.totalorder %s626_s20, %s674_s3 }
  0xf9   : > { %p427_p1 = scmp.lt.u32.totalorder %s425_s7, %s421_s29  ;;  %p429_p6 = scmp.lt.u32.totalorder %s421_s29, %s626_s20 }
  0xfa   : > { %p423_p8 = pnand %p422_p5, %p683_p11 }
  0xfb   : > { %p428_p3 = por %p427_p1, %p426_p0 }
  0xfc   : > { %p424_p9 = pneg %p423_p8 }
  0xfd   : > { %p430_p12 = por %p429_p6, %p428_p3 }
  0xff   : > { %p431_p13 = pnand %p430_p12, %p424_p9 }
 0x101   : > { %434 = shalt.err (!%p431_p13)
}
 0x102   : > { %329 = dma.vmem_to_hbm [thread:$0]  (%p683_p11), %s628_s11, 128, %s626_s20, %s230_s22  }
 0x103 PF: > { %s255_s6 = sand.u32 1, %s461_s12   ;;  %p684_p7 = scmp.ne.s32.totalorder %s679_s25, 0 }
 0x104   : > { %p685_p10 = scmp.ge.s32.totalorder %s473_s15, 2  ;;  %s256_s8 = scalar_lea.sflag [#allocation4], %s255_s6 }
 0x106   : > { %p336_p2 = pnand %p685_p10, %p684_p7 }
 0x108   : > { %456 = dma.done.wait (!%p336_p2), %s256_s8, 128  }
 0x109   : > { %458 = vsyncadd (!%p336_p2), %s256_s8, 4294967168  ;;  %p16_p4 = scmp.ge.s32.totalorder %s522_s18, 4   ;;  %s686_s12 = smov %s465_s13 }
 0x10a   : > { %s687_s13 = smov %s469_s14  ;;  %s688_s14 = smov %s534_s21 }
 0x10b   : > { %s689_s15 = smov %s522_s18  ;;  %18 = sbr.rel (!%p16_p4) target bundleno = 5 (0x5), region = 77 }
 0x112   :  { %261 = vsyncpa [#allocation3], 1 }
 0x113   :  { %263 = vsyncpa [#allocation3 + $0x1], 1 }
 0x114   :  { %264 = vsyncpa [#allocation4], 1 }
 0x115   :  { %266 = vsyncpa [#allocation4 + $0x1], 1 }

</bundles_post_ra>
